<compile_context>
chip_gen: v7x
topology: tpu7x:2x2x1
jax: 0.10.0
libtpu: 0.0.40
codegen_flags: <defaults>
</compile_context>

<pallas_src>
import functools

import jax
import jax.numpy as jnp
from jax.experimental import pallas as pl
from jax.experimental.pallas import tpu as pltpu

_LANES = 128


def _cdiv(a, b):
    return -(-a // b)


def _pow_const(x, g):
    """x**g for a compile-time constant g, avoiding EUP exp/log when possible."""
    g = float(g)
    if g == 0.0:
        return jnp.ones_like(x)            # matches torch.pow(x, 0) == 1
    if g.is_integer() and 0.0 < g <= 32.0:
        n = int(g)
        result = None
        acc = x
        while n:                            # exponentiation by squaring (pure VPU)
            if n & 1:
                result = acc if result is None else result * acc
            n >>= 1
            if n:
                acc = acc * acc
        return result
    # Non-integer exponent: clamp base so exp(g*log(base)) never sees log(<0).
    return jnp.power(jnp.maximum(x, 0.0), g)


def _asl_kernel(logits_ref, tgt_ref, out_ref, *, gamma_pos, gamma_neg, eps,
                b_true, tb, mean_reduce):
    x = logits_ref[...].astype(jnp.float32)        # (TB, C) logical width C
    tgt = tgt_ref[...]                             # (TB, 1) int32
    TB, C = x.shape

    # ---- log-softmax; exp computed once and reused for the probabilities ----
    m = jnp.max(x, axis=-1, keepdims=True)
    z = x - m
    e = jnp.exp(z)
    sumexp = jnp.sum(e, axis=-1, keepdims=True)
    log_preds = z - jnp.log(sumexp)                # (TB, C)

    # ---- negative-branch weight p^gamma_neg applied everywhere (full width);
    #      the target column is fixed up below with narrow per-row scalars,
    #      saving a full-width select+mul over the two-branch formulation. ----
    if gamma_neg == 0.0:
        wlp_neg = log_preds
    else:
        probs = e * pl.reciprocal(sumexp, approx=True)
        wlp_neg = _pow_const(probs, gamma_neg) * log_preds

    class_ids = jax.lax.broadcasted_iota(jnp.int32, (1, C), dimension=1)
    is_target = class_ids == tgt                   # (TB, C) via broadcast

    lp_t = jnp.sum(jnp.where(is_target, log_preds, 0.0), axis=-1, keepdims=True)
    p_t = jnp.exp(lp_t)                            # exact target prob (narrow EUP)
    target_term = _pow_const(1.0 - p_t, gamma_pos) * lp_t          # (TB, 1)

    # loss_row = -[(1-eps) * (w*lp)[target] + (eps/C) * sum_j (w*lp)_j]
    if eps > 0:
        total_neg = jnp.sum(wlp_neg, axis=-1, keepdims=True)        # (TB, 1)
        total_term = total_neg - _pow_const(p_t, gamma_neg) * lp_t + target_term
        row_loss = -((1.0 - eps) * target_term + (eps / C) * total_term)
    else:
        row_loss = -target_term                                     # (TB, 1)

    if mean_reduce:
        # Mask out-of-range rows of the ragged last tile AFTER all reductions;
        # garbage rows never leak because jnp.where picks 0.0 for them.
        if b_true % tb != 0:
            row_ids = (pl.program_id(0) * tb
                       + jax.lax.broadcasted_iota(jnp.int32, (TB, 1), dimension=0))
            row_loss = jnp.where(row_ids < b_true, row_loss, 0.0)
        tile_sum = jnp.sum(row_loss, axis=0, keepdims=True)          # (1, 1)
        out_ref[...] = jnp.broadcast_to(tile_sum, (8, _LANES))       # lane-dense
    else:
        # Per-sample losses replicated across 128 lanes (unmasked stores);
        # out-of-range rows of the ragged last tile are dropped by Mosaic.
        out_ref[...] = jnp.broadcast_to(row_loss, (TB, _LANES))


def _choose_tile_rows(B, C, in_itemsize):
    """Pick the batch-tile row count from the VMEM budget of the current chip."""
    try:
        info = pltpu.get_tpu_info()
        vmem_bytes = int(getattr(info, "vmem_capacity_bytes", 64 * 1024 * 1024))
    except Exception:
        vmem_bytes = 64 * 1024 * 1024
    small_vmem = vmem_bytes <= 64 * 1024 * 1024        # v7x: 64 MiB per TC
    if B < 8:
        return B, small_vmem                           # full-dim block (legal)
    # Live bytes per tile row: double-buffered input + ~6 f32 full-width temps.
    per_row = C * (2 * in_itemsize + 6 * 4)
    budget = (18 if small_vmem else 48) * 1024 * 1024
    row_cap = 1024 if small_vmem else 4096
    tb = min(budget // per_row, row_cap, max(8, (B // 8) * 8))
    tb = max(8, (tb // 8) * 8)
    # Guarantee >=2 grid steps so ("parallel",) can use both v7x TensorCores.
    if B >= 16:
        while tb > 8 and _cdiv(B, tb) < 2:
            tb = max(8, ((tb // 2) // 8) * 8)
    return tb, small_vmem


def asl_single_label_loss(inputs, target, *, gamma_pos=0.0, gamma_neg=4.0,
                          eps=0.1, reduction="mean"):
    """Pallas implementation of ASLSingleLabel.forward.

    inputs: (B, C) float logits (f32 or bf16)
    target: (B,)  integer class indices
    returns: scalar f32 loss for reduction='mean', else per-sample (B,) f32.
    """
    B, C = inputs.shape
    tb, small_vmem = _choose_tile_rows(B, C, jnp.dtype(inputs.dtype).itemsize)
    num_tiles = _cdiv(B, tb)
    mean_reduce = (reduction == "mean")

    tgt2d = target.astype(jnp.int32).reshape(B, 1)

    kernel = functools.partial(
        _asl_kernel,
        gamma_pos=float(gamma_pos), gamma_neg=float(gamma_neg), eps=float(eps),
        b_true=B, tb=tb, mean_reduce=mean_reduce)

    in_specs = [
        pl.BlockSpec((tb, C), lambda i: (i, 0)),   # full-C block: no class pad
        pl.BlockSpec((tb, 1), lambda i: (i, 0)),
    ]
    if mean_reduce:
        out_shape = jax.ShapeDtypeStruct((num_tiles * 8, _LANES), jnp.float32)
        out_specs = pl.BlockSpec((8, _LANES), lambda i: (i, 0))
    else:
        out_shape = jax.ShapeDtypeStruct((B, _LANES), jnp.float32)
        out_specs = pl.BlockSpec((tb, _LANES), lambda i: (i, 0))

    out = pl.pallas_call(
        kernel,
        out_shape=out_shape,
        grid=(num_tiles,),
        in_specs=in_specs,
        out_specs=out_specs,
        compiler_params=pltpu.CompilerParams(
            dimension_semantics=("parallel",),
            vmem_limit_bytes=(32 if small_vmem else 64) * 1024 * 1024),
    )(inputs, tgt2d)

    if mean_reduce:
        partial = out.reshape(num_tiles, 8, _LANES)[:, 0, 0]
        return jnp.sum(partial) * (1.0 / B)
    return out[:, 0]


def _reference(inputs, target, gamma_pos, gamma_neg, eps, reduction="mean"):
    """Pure-JAX transcription of the PyTorch module."""
    x = inputs.astype(jnp.float32)
    C = x.shape[-1]
    lp = jax.nn.log_softmax(x, axis=-1)
    t = jax.nn.one_hot(target, C, dtype=jnp.float32)
    anti = 1.0 - t
    xs_pos = jnp.exp(lp) * t
    xs_neg = (1.0 - jnp.exp(lp)) * anti
    w = jnp.power(1.0 - xs_pos - xs_neg, gamma_pos * t + gamma_neg * anti)
    lpw = lp * w
    tc = t * (1.0 - eps) + eps / C if eps > 0 else t
    loss = -(tc * lpw).sum(-1)
    if reduction == "mean":
        return loss.mean()
    return loss


if __name__ == "__main__":
    key = jax.random.PRNGKey(0)
    B, C = 8, 32
    k1, k2 = jax.random.split(key)
    logits = jax.random.normal(k1, (B, C), dtype=jnp.float32)
    target = jax.random.randint(k2, (B,), 0, C, dtype=jnp.int32)

    # default module config: gamma_pos=0, gamma_neg=4, eps=0.1, reduction='mean'
    loss = asl_single_label_loss(logits, target, gamma_pos=0, gamma_neg=4,
                                 eps=0.1, reduction="mean")
    loss = jax.block_until_ready(loss)
    ref = _reference(logits, target, 0.0, 4.0, 0.1, "mean")
    assert abs(float(loss) - float(ref)) <= 1e-4 + 1e-3 * abs(float(ref)), (
        float(loss), float(ref))

    # non-'mean' reduction path (per-sample losses)
    per = asl_single_label_loss(logits, target, gamma_pos=0, gamma_neg=4,
                                eps=0.1, reduction="none")
    per = jax.block_until_ready(per)
    ref_per = _reference(logits, target, 0.0, 4.0, 0.1, "none")
    assert bool(jnp.allclose(per, ref_per, rtol=1e-3, atol=1e-4)), (per, ref_per)

    print("KERNEL_OK")
</pallas_src>

<mosaic_0001>
module attributes {stable_mosaic.version = 11 : i64} {
  func.func @_asl_kernel(%arg0: i32, %arg1: memref<8x32xf32, #tpu.memory_space<vmem>>, %arg2: memref<8x1xi32, #tpu.memory_space<vmem>>, %arg3: memref<8x128xf32, #tpu.memory_space<vmem>>) attributes {dimension_semantics = [#tpu.dimension_semantics<parallel>], iteration_bounds = array<i64: 1>, scalar_prefetch = 0 : i64, scratch_operands = 0 : i64, tpu.core_type = #tpu.core_type<tc>, window_params = [{transform_indices = @transform_0, window_bounds = array<i64: 8, 32>}, {transform_indices = @transform_1, window_bounds = array<i64: 8, 1>}, {transform_indices = @transform_2, window_bounds = array<i64: 8, 128>}]} {
    %c0 = arith.constant 0 : index
    %c0_0 = arith.constant 0 : index
    %0 = vector.load %arg1[%c0, %c0_0] : memref<8x32xf32, #tpu.memory_space<vmem>>, vector<8x32xf32>
    %c0_1 = arith.constant 0 : index
    %c0_2 = arith.constant 0 : index
    %1 = vector.load %arg2[%c0_1, %c0_2] : memref<8x1xi32, #tpu.memory_space<vmem>>, vector<8x1xi32>
    %cst = arith.constant dense<0xFF800000> : vector<8xf32>
    %2 = vector.multi_reduction <maximumf>, %0, %cst [1] : vector<8x32xf32> to vector<8xf32>
    %3 = vector.shape_cast %2 : vector<8xf32> to vector<8x1xf32>
    %4 = vector.broadcast %3 : vector<8x1xf32> to vector<8x32xf32>
    %5 = arith.subf %0, %4 : vector<8x32xf32>
    %6 = math.exp %5 : vector<8x32xf32>
    %cst_3 = arith.constant dense<0.000000e+00> : vector<8xf32>
    %7 = vector.multi_reduction <add>, %6, %cst_3 [1] : vector<8x32xf32> to vector<8xf32>
    %8 = vector.shape_cast %7 : vector<8xf32> to vector<8x1xf32>
    %9 = math.log %8 : vector<8x1xf32>
    %10 = vector.broadcast %9 : vector<8x1xf32> to vector<8x32xf32>
    %11 = arith.subf %5, %10 : vector<8x32xf32>
    %12 = tpu.reciprocal %8 {approx = true} : vector<8x1xf32> -> vector<8x1xf32>
    %13 = vector.broadcast %12 : vector<8x1xf32> to vector<8x32xf32>
    %14 = arith.mulf %6, %13 : vector<8x32xf32>
    %15 = arith.mulf %14, %14 : vector<8x32xf32>
    %16 = arith.mulf %15, %15 : vector<8x32xf32>
    %17 = arith.mulf %16, %11 : vector<8x32xf32>
    %18 = tpu.iota {dimensions = array<i32: 1>} : vector<1x32xi32>
    %19 = vector.broadcast %18 : vector<1x32xi32> to vector<8x32xi32>
    %20 = vector.broadcast %1 : vector<8x1xi32> to vector<8x32xi32>
    %21 = arith.cmpi eq, %19, %20 : vector<8x32xi32>
    %cst_4 = arith.constant 0.000000e+00 : f32
    %22 = vector.broadcast %cst_4 : f32 to vector<8x32xf32>
    %23 = arith.select %21, %11, %22 : vector<8x32xi1>, vector<8x32xf32>
    %cst_5 = arith.constant dense<0.000000e+00> : vector<8xf32>
    %24 = vector.multi_reduction <add>, %23, %cst_5 [1] : vector<8x32xf32> to vector<8xf32>
    %25 = vector.shape_cast %24 : vector<8xf32> to vector<8x1xf32>
    %26 = math.exp %25 : vector<8x1xf32>
    %cst_6 = arith.constant 1.000000e+00 : f32
    %27 = vector.broadcast %cst_6 : f32 to vector<8x1xf32>
    %28 = arith.mulf %27, %25 : vector<8x1xf32>
    %cst_7 = arith.constant dense<0.000000e+00> : vector<8xf32>
    %29 = vector.multi_reduction <add>, %17, %cst_7 [1] : vector<8x32xf32> to vector<8xf32>
    %30 = vector.shape_cast %29 : vector<8xf32> to vector<8x1xf32>
    %31 = arith.mulf %26, %26 : vector<8x1xf32>
    %32 = arith.mulf %31, %31 : vector<8x1xf32>
    %33 = arith.mulf %32, %25 : vector<8x1xf32>
    %34 = arith.subf %30, %33 : vector<8x1xf32>
    %35 = arith.addf %34, %28 : vector<8x1xf32>
    %cst_8 = arith.constant 0.899999976 : f32
    %36 = vector.broadcast %cst_8 : f32 to vector<8x1xf32>
    %37 = arith.mulf %36, %28 : vector<8x1xf32>
    %cst_9 = arith.constant 3.125000e-03 : f32
    %38 = vector.broadcast %cst_9 : f32 to vector<8x1xf32>
    %39 = arith.mulf %38, %35 : vector<8x1xf32>
    %40 = arith.addf %37, %39 : vector<8x1xf32>
    %cst_10 = arith.constant 0.000000e+00 : f32
    %41 = vector.broadcast %cst_10 : f32 to vector<8x1xf32>
    %42 = arith.subf %41, %40 : vector<8x1xf32>
    %cst_11 = arith.constant dense<0.000000e+00> : vector<1xf32>
    %43 = vector.multi_reduction <add>, %42, %cst_11 [0] : vector<8x1xf32> to vector<1xf32>
    %44 = vector.shape_cast %43 : vector<1xf32> to vector<1x1xf32>
    %45 = vector.shape_cast %44 : vector<1x1xf32> to vector<1x1xf32>
    %46 = vector.broadcast %45 : vector<1x1xf32> to vector<8x128xf32>
    %c0_12 = arith.constant 0 : index
    %c0_13 = arith.constant 0 : index
    %47 = vector.load %arg3[%c0_12, %c0_13] : memref<8x128xf32, #tpu.memory_space<vmem>>, vector<8x128xf32>
    tpu.vector_store %arg3[%c0_12, %c0_13], %46 {strides = array<i32>} : memref<8x128xf32, #tpu.memory_space<vmem>>, vector<8x128xf32>,
    return
  }
  func.func @transform_0(%arg0: i32) -> (i32, i32) {
    %c0_i32 = arith.constant 0 : i32
    %c0_i32_0 = arith.constant 0 : i32
    return %arg0, %c0_i32 : i32, i32
  }
  func.func @transform_1(%arg0: i32) -> (i32, i32) {
    %c0_i32 = arith.constant 0 : i32
    %c0_i32_0 = arith.constant 0 : i32
    return %arg0, %c0_i32 : i32, i32
  }
  func.func @transform_2(%arg0: i32) -> (i32, i32) {
    %c0_i32 = arith.constant 0 : i32
    %c0_i32_0 = arith.constant 0 : i32
    return %arg0, %c0_i32 : i32, i32
  }
}

</mosaic_0001>

<bundles_post_ra>
// kernel: tpu_custom_call.1
= control target key start
LH: loop header
LB: loop body
LE: loop exit
PB: predicated region body
PF: predicated region fallthrough
CT: control target
= control target key end

     0   :  { %vm14_vm0 = vcmask 261120   ;;  %s152_s0 = inlined_call_operand.vmem [shape: f32[8,32], index: 0, kind: input, shape index: {}]   ;;  %s153_s1 = inlined_call_operand.vmem [shape: s32[8,1], index: 1, kind: input, shape index: {}]   ;;  %s154_s2 = inlined_call_operand.hbm [shape: f32[8,128], index: 2, kind: output, shape index: {}]  }
   0x1   :  { %v12_v0 = vld [vmem:[%s152_s0] sm:$0xff] }
   0x2   :  { %7 = vsyncpa [#allocation3], 0  ;;  %v15_v1 = vsel %vm14_vm0, %v12_v0, -inf  ;;  %v13_v2 = vld [vmem:[%s153_s1] sm:$0xff]  ;;  %v113_v3 = vmov 0   ;;  %v32_v10 = vlaneseq  ;;  %s114_s0 = smov [#allocation2]  }
   0x3   :  { %16 = vmax.xlane.f32.xlu0 %v15_v1  ;;  %79 = vset.pattern.permute.xlu1 %v113_v3  ;;  %s69_s1 = sshll.u32 %s114_s0, 4  ;;  %s70_s1 = int_to_ptr.vmem [resolvable:$true] %s69_s1 }
   0x4   :  { %80 = vset.pattern.permute.xlu0 %v113_v3  ;;  %35 = vperm.xlu1 %79, %v13_v2   ;;  %v33_v11 = vand.u32 127, %v32_v10  ;;  %s89_s13 = scalar_lea.vmem %s70_s1, 128  ;;  %p94_p1 = scmp.lt.s32.totalorder %s70_s1, %s70_s1 }
   0x5   :  { %p90_p0 = scmp.ne.s32.totalorder %s70_s1, %s89_s13  ;;  %p95_p2 = scmp.lt.s32.totalorder %s89_s13, %s89_s13 }
   0x7   :  { %p96_p3 = por %p95_p2, %p94_p1 }
   0x9   :  { %p97_p4 = pnand %p96_p3, %p90_p0 }
  0x83   :  { %v36_v12 = vpop.permute.xlu1 %35 }
  0x84   :  { %vm37_vm1 = vcmp.eq.s32.totalorder %v33_v11, %v36_v12 }
  0x90   :  { %v17_v4 = vpop.xlane.xlu0 %16 }
  0x91   :  { %v18_v5 = vsub.f32 %v12_v0, %v17_v4 }
  0x93   :  { %v19_v6 = vmul.f32 1.442695, %v18_v5 }
  0x95   :  { %81 = vpow2.f32 %v19_v6 }
  0x9f   :  { %v82_v7 = vpop.eup %81 }
  0xa0   :  { %v21_v8 = vsel %vm14_vm0, %v82_v7, 0.0 }
  0xa1   :  { %22 = vadd.xlane.f32.xlu0 %v21_v8 }
 0x12e   :  { %v23_v9 = vpop.xlane.xlu0 %22 }
 0x12f   :  { %83 = vlog2.f32 %v23_v9 }
 0x130   :  { %85 = vrcp.f32 %v23_v9 }
 0x139   :  { %v84_v13 = vpop.eup %83 }
 0x13a   :  { %v86_v14 = vpop.eup %85  ;;  %v25_v15 = vmul.f32 0.6931472, %v84_v13 }
 0x13b   :  { %v28_v16 = vmul.f32 %v86_v14, %v82_v7 }
 0x13c   :  { %v26_v17 = vsub.f32 %v18_v5, %v25_v15 }
 0x13d   :  { %v29_v18 = vmul.f32 %v28_v16, %v28_v16 }
 0x13e   :  { %v38_v19 = vsel %vm37_vm1, %v26_v17, 0.0 }
 0x13f   :  { %v39_v20 = vsel %vm14_vm0, %v38_v19, 0.0  ;;  %v30_v21 = vmul.f32 %v29_v18, %v29_v18 }
 0x140   :  { %40 = vadd.xlane.f32.xlu1 %v39_v20 }
 0x141   :  { %v31_v22 = vmul.f32 %v30_v21, %v26_v17 }
 0x143   :  { %v44_v23 = vsel %vm14_vm0, %v31_v22, 0.0 }
 0x144   :  { %45 = vadd.xlane.f32.xlu0 %v44_v23 }
 0x1cd   :  { %v41_v24 = vpop.xlane.xlu1 %40 }
 0x1ce   :  { %v42_v25 = vmul.f32 1.442695, %v41_v24  ;;  %v52_v33 = vmul.f32 0.9, %v41_v24 }
 0x1d0   :  { %87 = vpow2.f32 %v42_v25 }
 0x1d1   :  { %v46_v30 = vpop.xlane.xlu0 %45 }
 0x1da   :  { %v88_v26 = vpop.eup %87 }
 0x1db   :  { %v47_v27 = vmul.f32 %v88_v26, %v88_v26 }
 0x1dd   :  { %v48_v28 = vmul.f32 %v47_v27, %v47_v27 }
 0x1df   :  { %v49_v29 = vmul.f32 %v48_v28, %v41_v24 }
 0x1e1   :  { %v50_v31 = vsub.f32 %v46_v30, %v49_v29 }
 0x1e3   :  { %v51_v32 = vadd.f32 %v50_v31, %v41_v24 }
 0x1e5   :  { %v53_v34 = vmul.f32 0.003125, %v51_v32 }
 0x1e7   :  { %v54_v35 = vadd.f32 %v53_v34, %v52_v33 }
 0x1e9   :  { %v55_v36 = vsub.f32 0.0, %v54_v35 }
 0x1eb   :  { %v56_v37 = vrot.slane %v55_v36, 4 }
 0x1ed   :  { %v57_v38 = vadd.f32 %v56_v37, %v55_v36 }
 0x1ef   :  { %v58_v39 = vrot.slane %v57_v38, 2 }
 0x1f1   :  { %v59_v40 = vadd.f32 %v58_v39, %v57_v38 }
 0x1f3   :  { %v60_v41 = vrot.slane %v59_v40, 1 }
 0x1f5   :  { %v61_v42 = vadd.f32 %v60_v41, %v59_v40 }
 0x1f7   :  { %62 = vst [vmem:[#allocation2] sm:$0xff] %v61_v42 }
 0x1f8   :  { %100 = shalt.err (!%p97_p4)
}
 0x1f9   :  { %s101_s16 = scalar_lea.hbm %s154_s2, 128 }
 0x1fa   :  { %p102_p5 = scmp.ne.s32.totalorder %s154_s2, %s101_s16  ;;  %p105_p6 = scmp.lt.u32.totalorder %s101_s16, %s154_s2 }
 0x1fc   :  { %p107_p7 = pnand %p105_p6, %p102_p5 }
 0x1fe   :  { %110 = shalt.err (!%p107_p7)
}
 0x1ff   :  { %72 = dma.vmem_to_hbm [thread:$0]  %s70_s1, 128, %s154_s2, [#allocation3]  }
 0x200   :  { %111 = dma.done.wait [#allocation3], 128  }
 0x201   :  { %112 = vsyncadd [#allocation3], 4294967168 }
 0x202   :  { %76 = vsyncpa [#allocation3], 1 }

</bundles_post_ra>
